<compile_context>
chip_gen: v7x
topology: tpu7x:2x2x1
jax: 0.10.0
libtpu: 0.0.40
codegen_flags: <defaults>
</compile_context>

<pallas_src>
import functools

import jax
import jax.numpy as jnp
from jax.experimental import pallas as pl
from jax.experimental.pallas import tpu as pltpu


def _linear_kernel(x_ref, w_ref, b_ref, o_ref):
    # Single fused Linear: MXU matmul with f32 accumulation + bias add (VPU).
    acc = jnp.dot(x_ref[...], w_ref[...], preferred_element_type=jnp.float32)
    o_ref[...] = (acc + b_ref[...]).astype(o_ref.dtype)


def _round_up(n, m):
    return ((n + m - 1) // m) * m


@functools.partial(jax.jit, static_argnames=("block_m",))
def label_classifier_forward(x, w, b, *, block_m=256):
    """y = x @ w.T + b  (PyTorch nn.Linear layout: w is (out_dim, in_dim),
    b is (out_dim,)).  Supports arbitrary leading dims on x."""
    orig_lead = x.shape[:-1]
    in_dim = x.shape[-1]
    out_dim = w.shape[0]

    x2 = x.reshape(-1, in_dim)
    B = x2.shape[0]

    # ---- batch tile sizing -------------------------------------------------
    bm = min(block_m, _round_up(B, 8))
    bm = max(8, _round_up(bm, 8))
    # If a big batch would collapse into a single grid step, split it in two so
    # dimension_semantics=("parallel",) can shard it across v7x's 2 TensorCores.
    if B >= 256 and _round_up(B, bm) == bm:
        bm = _round_up(-(-B // 2), 128)
    b_pad = _round_up(B, bm)

    # ---- lane-dense output: pad out_dim to a multiple of 128 ---------------
    n_pad = _round_up(out_dim, 128)

    # Weight transposed to (in_dim, n_pad) with zero-padded output columns.
    wt = jnp.zeros((in_dim, n_pad), w.dtype).at[:, :out_dim].set(w.T)
    bp = jnp.zeros((1, n_pad), b.dtype).at[0, :out_dim].set(b)
    xp = x2 if b_pad == B else jnp.pad(x2, ((0, b_pad - B), (0, 0)))

    grid = (b_pad // bm,)

    # VMEM budget: double-buffered x/out tiles + resident weights (x2 safety),
    # clamped so it is legal on every chip generation.
    itemsize = jnp.dtype(x.dtype).itemsize
    est = 2 * bm * (in_dim + n_pad) * 4 + 2 * (in_dim + 1) * n_pad * itemsize
    vmem_limit = int(min(48 * 1024 * 1024, max(32 * 1024 * 1024, 2 * est)))

    out = pl.pallas_call(
        _linear_kernel,
        out_shape=jax.ShapeDtypeStruct((b_pad, n_pad), x.dtype),
        grid_spec=pltpu.PrefetchScalarGridSpec(
            num_scalar_prefetch=0,
            grid=grid,
            in_specs=[
                # batch tile of x
                pl.BlockSpec((bm, in_dim), lambda i: (i, 0)),
                # weight / bias: whole arrays, resident across grid steps
                pl.BlockSpec((in_dim, n_pad), lambda i: (0, 0)),
                pl.BlockSpec((1, n_pad), lambda i: (0, 0)),
            ],
            out_specs=pl.BlockSpec((bm, n_pad), lambda i: (i, 0)),
        ),
        compiler_params=pltpu.CompilerParams(
            dimension_semantics=("parallel",),
            vmem_limit_bytes=vmem_limit,
        ),
    )(xp, wt, bp)

    return out[:B, :out_dim].reshape(*orig_lead, out_dim)


def init_label_classifier_params(key, in_dim, out_dim):
    """PyTorch nn.Linear default init: uniform(-1/sqrt(fan_in), 1/sqrt(fan_in))."""
    k1, k2 = jax.random.split(key)
    bound = 1.0 / jnp.sqrt(in_dim)
    w = jax.random.uniform(k1, (out_dim, in_dim), jnp.float32,
                           minval=-bound, maxval=bound)
    b = jax.random.uniform(k2, (out_dim,), jnp.float32,
                           minval=-bound, maxval=bound)
    return w, b


def label_classifier_reference(x, w, b):
    """Pure-JAX reference (PyTorch nn.Linear semantics)."""
    return x @ w.T + b


if __name__ == "__main__":
    in_dim = 64
    out_dim = 10
    batch = 16

    key = jax.random.PRNGKey(0)
    kx, kp = jax.random.split(key)
    x = jax.random.normal(kx, (batch, in_dim), jnp.float32)
    w, b = init_label_classifier_params(kp, in_dim, out_dim)

    out = label_classifier_forward(x, w, b)
    out = jax.block_until_ready(out)

    ref = label_classifier_reference(x, w, b)
    assert out.shape == (batch, out_dim)
    assert jnp.allclose(out, ref, atol=1e-5, rtol=1e-5), "mismatch vs reference"

    print("KERNEL_OK")
</pallas_src>

<mosaic_0001>
module attributes {stable_mosaic.version = 11 : i64} {
  func.func @_linear_kernel(%arg0: i32, %arg1: memref<16x64xf32, #tpu.memory_space<vmem>>, %arg2: memref<64x128xf32, #tpu.memory_space<vmem>>, %arg3: memref<1x128xf32, #tpu.memory_space<vmem>>, %arg4: memref<16x128xf32, #tpu.memory_space<vmem>>) attributes {dimension_semantics = [#tpu.dimension_semantics<parallel>], iteration_bounds = array<i64: 1>, scalar_prefetch = 0 : i64, scratch_operands = 0 : i64, tpu.core_type = #tpu.core_type<tc>, window_params = [{transform_indices = @transform_0, window_bounds = array<i64: 16, 64>}, {pipeline_mode = #tpu.pipeline_mode<synchronous>, transform_indices = @transform_1, window_bounds = array<i64: 64, 128>}, {pipeline_mode = #tpu.pipeline_mode<synchronous>, transform_indices = @transform_2, window_bounds = array<i64: 1, 128>}, {transform_indices = @transform_3, window_bounds = array<i64: 16, 128>}]} {
    %c0 = arith.constant 0 : index
    %c0_0 = arith.constant 0 : index
    %0 = vector.load %arg1[%c0, %c0_0] : memref<16x64xf32, #tpu.memory_space<vmem>>, vector<16x64xf32>
    %c0_1 = arith.constant 0 : index
    %c0_2 = arith.constant 0 : index
    %1 = vector.load %arg2[%c0_1, %c0_2] : memref<64x128xf32, #tpu.memory_space<vmem>>, vector<64x128xf32>
    %cst = arith.constant dense<0.000000e+00> : vector<16x128xf32>
    %2 = tpu.matmul %0, %1, %cst {dimension_numbers = #tpu.dot_dimension_numbers<[1], [0], [0], [1], [0, 0, 1, 1], [], []>} : vector<16x64xf32>, vector<64x128xf32>, vector<16x128xf32> -> vector<16x128xf32>
    %c0_3 = arith.constant 0 : index
    %c0_4 = arith.constant 0 : index
    %3 = vector.load %arg3[%c0_3, %c0_4] : memref<1x128xf32, #tpu.memory_space<vmem>>, vector<1x128xf32>
    %4 = vector.broadcast %3 : vector<1x128xf32> to vector<16x128xf32>
    %5 = arith.addf %2, %4 : vector<16x128xf32>
    %c0_5 = arith.constant 0 : index
    %c0_6 = arith.constant 0 : index
    %6 = vector.load %arg4[%c0_5, %c0_6] : memref<16x128xf32, #tpu.memory_space<vmem>>, vector<16x128xf32>
    tpu.vector_store %arg4[%c0_5, %c0_6], %5 {strides = array<i32>} : memref<16x128xf32, #tpu.memory_space<vmem>>, vector<16x128xf32>,
    return
  }
  func.func @transform_0(%arg0: i32) -> (i32, i32) {
    %c0_i32 = arith.constant 0 : i32
    %c0_i32_0 = arith.constant 0 : i32
    return %arg0, %c0_i32 : i32, i32
  }
  func.func @transform_1(%arg0: i32) -> (i32, i32) {
    %c0_i32 = arith.constant 0 : i32
    %c0_i32_0 = arith.constant 0 : i32
    %c0_i32_1 = arith.constant 0 : i32
    return %c0_i32, %c0_i32_0 : i32, i32
  }
  func.func @transform_2(%arg0: i32) -> (i32, i32) {
    %c0_i32 = arith.constant 0 : i32
    %c0_i32_0 = arith.constant 0 : i32
    %c0_i32_1 = arith.constant 0 : i32
    return %c0_i32, %c0_i32_0 : i32, i32
  }
  func.func @transform_3(%arg0: i32) -> (i32, i32) {
    %c0_i32 = arith.constant 0 : i32
    %c0_i32_0 = arith.constant 0 : i32
    return %arg0, %c0_i32 : i32, i32
  }
}

</mosaic_0001>

<bundles_post_ra>
// kernel: label_classifier_forward.1
= control target key start
LH: loop header
LB: loop body
LE: loop exit
PB: predicated region body
PF: predicated region fallthrough
CT: control target
= control target key end

     0   :  { %vm32_vm0 = vcmask 523264   ;;  %s277_s0 = inlined_call_operand.vmem [shape: f32[16,64], index: 0, kind: input, shape index: {}]   ;;  %s278_s1 = inlined_call_operand.vmem [shape: f32[64,128], index: 1, kind: input, shape index: {}]   ;;  %s279_s2 = inlined_call_operand.vmem [shape: f32[1,128], index: 2, kind: input, shape index: {}]   ;;  %s280_s3 = inlined_call_operand.hbm [shape: f32[16,128], index: 3, kind: output, shape index: {}]  }
   0x1   :  { %v17_v0 = vld [vmem:[%s278_s1] sm:$0xff]  ;;  %v18_v1 = vld [vmem:[%s278_s1 + $0x8] sm:$0xff]  ;;  %v19_v2 = vld [vmem:[%s278_s1 + $0x10] sm:$0xff] }
   0x2   :  { %v164_v3 = vpack.c.bf16 %v18_v1, %v17_v0  ;;  %v20_v4 = vld [vmem:[%s278_s1 + $0x18] sm:$0xff]  ;;  %v21_v6 = vld [vmem:[%s278_s1 + $0x20] sm:$0xff]  ;;  %v22_v7 = vld [vmem:[%s278_s1 + $0x28] sm:$0xff] }
   0x3   :  { %v168_v5 = vpack.c.bf16 %v20_v4, %v19_v2  ;;  %v15_v8 = vld [vmem:[%s277_s0] sm:$0xff] }
   0x4   :  { %165 = vmatprep.subr.bf16.mxu0 %v164_v3  ;;  %161 = vmatprep.mubr.msk.f32.mxu0 %vm32_vm0, %v15_v8 }
   0x5   :  { %8 = vsyncpa [#allocation3], 0  ;;  %167 = vmatpush3.bf16.msra.mxu0 %v164_v3  ;;  %v172_v9 = vpack.c.bf16 %v22_v7, %v21_v6  ;;  %v23_v10 = vld [vmem:[%s278_s1 + $0x30] sm:$0xff]  ;;  %v24_v11 = vld [vmem:[%s278_s1 + $0x38] sm:$0xff]  ;;  %s207_s7 = smov [#allocation2]  }
   0x6   :  { %169 = vmatprep.subr.bf16.mxu0 %v168_v5  ;;  %v176_v12 = vpack.c.bf16 %v24_v11, %v23_v10  ;;  %v16_v13 = vld [vmem:[%s277_s0 + $0x8] sm:$0xff]  ;;  %v132_v14 = vld [vmem:[%s279_s2] ss:$0 sm:$0xff]  ;;  %s121_s8 = sshll.u32 %s207_s7, 4  ;;  %s122_s8 = int_to_ptr.vmem [resolvable:$true] %s121_s8 }
   0x7   :  { %s183_s1 = scalar_lea.vmem %s122_s8, 256  ;;  %p188_p1 = scmp.lt.s32.totalorder %s122_s8, %s122_s8 }
   0x8   :  { %p184_p0 = scmp.ne.s32.totalorder %s122_s8, %s183_s1  ;;  %p189_p2 = scmp.lt.s32.totalorder %s183_s1, %s183_s1 }
   0x9   :  { %171 = vmatpush3.bf16.msra.mxu0 %v168_v5 }
   0xa   :  { %173 = vmatprep.subr.bf16.mxu0 %v172_v9  ;;  %p190_p3 = por %p189_p2, %p188_p1 }
   0xc   :  { %p191_p4 = pnand %p190_p3, %p184_p0 }
   0xd   :  { %175 = vmatpush3.bf16.msra.mxu0 %v172_v9 }
   0xe   :  { %177 = vmatprep.subr.bf16.mxu0 %v176_v12 }
  0x11   :  { %179 = vmatpush3.bf16.msra.mxu0 %v176_v12 }
  0x14   :  { %162 = vmatmul.mubr.msk.f32.vlgmr.msra.gmra.mrb[0].mxu0 %vm32_vm0, %v16_v13 }
  0xe7   :  { %v163_v15 = vpop.f32.mrb[0].mxu0 }
  0xe8   :  { %v111_v16 = vadd.f32 %v163_v15, %v132_v14  ;;  %v105_v17 = vpop.f32.mrb[1].mxu0 }
  0xe9   :  { %v106_v18 = vadd.f32 %v132_v14, %v105_v17 }
  0xea   :  { %115 = vst [vmem:[#allocation2 + $0x8] sm:$0xff] %v111_v16 }
  0xeb   :  { %114 = vst [vmem:[#allocation2] sm:$0xff] %v106_v18 }
  0xec   :  { %194 = shalt.err (!%p191_p4)
}
  0xed   :  { %s195_s2 = scalar_lea.hbm %s280_s3, 256 }
  0xee   :  { %p196_p5 = scmp.ne.s32.totalorder %s280_s3, %s195_s2  ;;  %p199_p6 = scmp.lt.u32.totalorder %s195_s2, %s280_s3 }
  0xf0   :  { %p201_p7 = pnand %p199_p6, %p196_p5 }
  0xf2   :  { %204 = shalt.err (!%p201_p7)
}
  0xf3   :  { %s208_s14 = smov 128   ;;  %s209_s15 = smov 8  }
  0xf4   :  { %127 = dma.vmem_to_hbm [thread:$0]  %s122_s8, 256, %s280_s3, [#allocation3], %s208_s14, %s208_s14, %s209_s15  }
  0xf5   :  { %205 = dma.done.wait [#allocation3], 256  }
  0xf6   :  { %206 = vsyncadd [#allocation3], 4294967040 }
  0xf7   :  { %131 = vsyncpa [#allocation3], 1 }

</bundles_post_ra>
